<compile_context>
chip_gen: v7x
topology: tpu7x:2x2x1
jax: 0.10.0
libtpu: 0.0.40
codegen_flags: <defaults>
</compile_context>

<pallas_src>
import numpy as np

import jax
import jax.numpy as jnp
from jax.experimental import pallas as pl
from jax.experimental.pallas import tpu as pltpu

_LANE = 128
_TARGET_BLOCK_BYTES = 2 << 20        # ~2 MiB per (1, TR, 128) block (dtype-aware rows)
_DEFAULT_MIN_PALLAS_BYTES = 2 << 20  # below this, fused XLA wins on launch overhead


def _scalar_multiply_kernel(x_ref, scale_ref, o_ref):
    # x_ref / o_ref: VMEM (1, TR, 128) tile of one channel.
    # scale_ref:     SMEM (C,) float32 per-channel scale (params[0] or 1.0).
    s = scale_ref[pl.program_id(0)]
    o_ref[...] = (x_ref[...].astype(jnp.float32) * s).astype(o_ref.dtype)


def _pick_row_tile(r, itemsize):
    """Largest row tile (multiple of 8, <= ~2 MiB) that keeps tiles full."""
    max_rows = max(8, (_TARGET_BLOCK_BYTES // (_LANE * itemsize)) // 8 * 8)
    if r <= max_rows:
        return r                       # full extent is always a legal block dim
    for cand in range(max_rows, 7, -8):
        if r % cand == 0:
            return cand                # equal, unmasked tiles
    return max_rows                    # rare: last row tile is masked/padded


def scalar_multiply(x, scalar, indices, *, min_pallas_bytes=_DEFAULT_MIN_PALLAS_BYTES):
    """JAX/Pallas implementation of ScalarMultiply.forward (batch must be 1)."""
    n, c, h, w = x.shape
    assert n == 1, "Reference module's squeeze/unsqueeze only round-trips for batch=1"

    # Static, de-duplicated, in-range channel list (the reference does a
    # per-channel membership test, so duplicates scale a channel only once).
    sel = sorted({int(i) for i in indices if 0 <= int(i) < c})
    if not sel:
        return x  # nothing selected -> identity

    # Per-channel scale: params[0] on selected channels, 1.0 elsewhere.  The
    # multiply runs in f32 and casts back to x.dtype (exact for unselected
    # channels; last-ULP-equivalent for bf16/f16 selected channels).
    mask = np.zeros((c,), dtype=bool)
    mask[sel] = True
    scale_vec = jnp.where(jnp.asarray(mask),
                          jnp.asarray(scalar, jnp.float32),
                          jnp.float32(1.0))

    l = h * w
    itemsize = x.dtype.itemsize
    use_pallas = (
        l % _LANE == 0                       # lane-dense view, no pad/slice round trips
        and (l // _LANE) >= 8                # avoid sublane-underfilled 1-channel blocks
        and c * l * itemsize >= min_pallas_bytes
    )
    if not use_pallas:
        # Fused XLA path: cheaper than padding/slicing around the kernel or
        # paying launch + per-step overhead on tiny tensors.
        return (x.astype(jnp.float32) * scale_vec.reshape(1, c, 1, 1)).astype(x.dtype)

    r = l // _LANE
    x3 = x.reshape(c, r, _LANE)              # bitcast under jit (lane-dense view)

    tr = _pick_row_tile(r, itemsize)
    n_row_tiles = pl.cdiv(r, tr)
    # v7x megacore: both TensorCores only get work if the grid has >= 2
    # (ideally >= 4) steps; halve the row tile while it stays a multiple of 8
    # (halving a divisor of r keeps tiles full).
    while c * n_row_tiles < 4 and tr % 16 == 0:
        tr //= 2
        n_row_tiles = pl.cdiv(r, tr)

    out3 = pl.pallas_call(
        _scalar_multiply_kernel,
        grid=(c, n_row_tiles),
        in_specs=[
            pl.BlockSpec((1, tr, _LANE), lambda ci, ri: (ci, ri, 0)),
            pl.BlockSpec(memory_space=pltpu.MemorySpace.SMEM),
        ],
        out_specs=pl.BlockSpec((1, tr, _LANE), lambda ci, ri: (ci, ri, 0)),
        out_shape=jax.ShapeDtypeStruct((c, r, _LANE), x.dtype),
        cost_estimate=pl.CostEstimate(
            flops=c * l,
            transcendentals=0,
            bytes_accessed=2 * c * l * itemsize + c * 4,
        ),
        compiler_params=pltpu.CompilerParams(
            dimension_semantics=("parallel", "parallel"),
        ),
        # TODO(synk): sweep pipeline_mode=pl.Buffered(3) on the x BlockSpec
        # (pure read+write pipeline; expected only a few %, measure first).
    )(x3, scale_vec)

    return out3.reshape(n, c, h, w)


if __name__ == "__main__":
    scalar = 2.5        # params[0] from the reference module's forward
    indices = (1, 3)    # channels to scale

    key0, key1 = jax.random.split(jax.random.PRNGKey(0))

    # Case 1: 128-lane-aligned spatial, forced through the Pallas path
    # (min_pallas_bytes=0 overrides the small-tensor fallback for the test).
    x1 = jax.random.normal(key0, (1, 4, 32, 32), dtype=jnp.float32)
    fn = jax.jit(scalar_multiply, static_argnums=(1, 2),
                 static_argnames=("min_pallas_bytes",))
    out1 = jax.block_until_ready(fn(x1, scalar, indices, min_pallas_bytes=0))
    ref1 = x1.at[:, list(indices), :, :].multiply(scalar)
    assert out1.shape == x1.shape and out1.dtype == x1.dtype
    assert jnp.allclose(out1, ref1, rtol=1e-6, atol=1e-6)

    # Case 2: unaligned spatial (15x15) -> fused-XLA fallback path.
    x2 = jax.random.normal(key1, (1, 4, 15, 15), dtype=jnp.float32)
    out2 = jax.block_until_ready(scalar_multiply(x2, scalar, indices))
    ref2 = x2.at[:, list(indices), :, :].multiply(scalar)
    assert out2.shape == x2.shape and out2.dtype == x2.dtype
    assert jnp.allclose(out2, ref2, rtol=1e-6, atol=1e-6)

    print("KERNEL_OK")
</pallas_src>

<mosaic_0001>
module attributes {stable_mosaic.version = 11 : i64} {
  func.func @_scalar_multiply_kernel(%arg0: i32, %arg1: i32, %arg2: memref<1x8x128xf32, #tpu.memory_space<vmem>>, %arg3: memref<4xf32, #tpu.memory_space<smem>>, %arg4: memref<1x8x128xf32, #tpu.memory_space<vmem>>) attributes {dimension_semantics = [#tpu.dimension_semantics<parallel>, #tpu.dimension_semantics<parallel>], iteration_bounds = array<i64: 4, 1>, scalar_prefetch = 0 : i64, scratch_operands = 0 : i64, tpu.core_type = #tpu.core_type<tc>, window_params = [{transform_indices = @transform_0, window_bounds = array<i64: 1, 8, 128>}, {transform_indices = @transform_1, window_bounds = array<i64: 4>}, {transform_indices = @transform_2, window_bounds = array<i64: 1, 8, 128>}]} {
    %0 = arith.index_cast %arg0 : i32 to index
    %1 = memref.load %arg3[%0] : memref<4xf32, #tpu.memory_space<smem>>
    %c0 = arith.constant 0 : index
    %c0_0 = arith.constant 0 : index
    %c0_1 = arith.constant 0 : index
    %2 = vector.load %arg2[%c0, %c0_0, %c0_1] : memref<1x8x128xf32, #tpu.memory_space<vmem>>, vector<1x8x128xf32>
    %3 = vector.broadcast %1 : f32 to vector<1x8x128xf32>
    %4 = arith.mulf %2, %3 : vector<1x8x128xf32>
    %c0_2 = arith.constant 0 : index
    %c0_3 = arith.constant 0 : index
    %c0_4 = arith.constant 0 : index
    %5 = vector.load %arg4[%c0_2, %c0_3, %c0_4] : memref<1x8x128xf32, #tpu.memory_space<vmem>>, vector<1x8x128xf32>
    tpu.vector_store %arg4[%c0_2, %c0_3, %c0_4], %4 {strides = array<i32>} : memref<1x8x128xf32, #tpu.memory_space<vmem>>, vector<1x8x128xf32>,
    return
  }
  func.func @transform_0(%arg0: i32, %arg1: i32) -> (i32, i32, i32) {
    %c0_i32 = arith.constant 0 : i32
    %c0_i32_0 = arith.constant 0 : i32
    return %arg0, %arg1, %c0_i32 : i32, i32, i32
  }
  func.func @transform_1(%arg0: i32, %arg1: i32) -> i32 {
    %c0_i32 = arith.constant 0 : i32
    %c0_i32_0 = arith.constant 0 : i32
    return %c0_i32 : i32
  }
  func.func @transform_2(%arg0: i32, %arg1: i32) -> (i32, i32, i32) {
    %c0_i32 = arith.constant 0 : i32
    %c0_i32_0 = arith.constant 0 : i32
    return %arg0, %arg1, %c0_i32 : i32, i32, i32
  }
}

</mosaic_0001>

<bundles_post_ra>
// kernel: scalar_multiply.1
= control target key start
LH: loop header
LB: loop body
LE: loop exit
PB: predicated region body
PF: predicated region fallthrough
CT: control target
= control target key end

     0   :  { %7 = vsyncpa [#allocation3], 0  ;;  %s381_s9 = smov 0   ;;  %s383_s10 = smov 0   ;;  %s441_s0 = inlined_call_operand.vmem [shape: f32[4,8,128], index: 0, kind: input, shape index: {}]   ;;  %s442_s1 = inlined_call_operand.vmem [shape: f32[4], index: 1, kind: input, shape index: {}]   ;;  %s443_s2 = inlined_call_operand.vmem [shape: f32[4,8,128], index: 2, kind: output, shape index: {}]  }
   0x1   :  { %s385_s11 = smov 0  }
   0x2 LB: > { %s276_s12 = sadd.s32 4294967295, %s363_s11   ;;  %s25_s13 = sadd.s32 1, %s359_s10  ;;  %s363_s11 = sphi %s385_s11, %s13_s11   ;;  %s359_s10 = sphi %s383_s10, %s447_s10   ;;  %s355_s9 = sphi %s381_s9, %s446_s9  }
   0x3   : > { %p27_p0 = scmp.ge.s32.totalorder %s25_s13, 4  ;;  %p278_p1 = scmp.ge.s32.totalorder %s363_s11, 1 }
   0x4   : > { %p107_p2 = scmp.lt.s32.totalorder %s363_s11, 5  ;;  %p406_p4 = scmp.eq.s32.totalorder %s276_s12, 0 }
   0x5   : > { %s449_s13 = smov (%p27_p0, %s25_s13), 0  ;;  %s120_s18 = sshll.u32 %s442_s1, 4  ;;  %s121_s18 = int_to_ptr.vmem [resolvable:$true] %s120_s18 }
   0x6   : > { %p402_p3 = pnand %p278_p1, %p107_p2  ;;  %s322_s19 = scalar_lea.vmem %s121_s18, 16 }
   0x7   : > { %p323_p7 = scmp.ne.s32.totalorder %s121_s18, %s322_s19  ;;  %p330_p11 = scmp.lt.s32.totalorder %s121_s18, %s121_s18 }
   0x8   : > { %p291_p5 = pneg %p402_p3  ;;  %p331_p12 = scmp.lt.s32.totalorder %s322_s19, %s322_s19 }
   0xa   : > { %p292_p6 = pnand %p406_p4, %p291_p5  ;;  %p332_p13 = por %p331_p12, %p330_p11 }
   0xc   : > { %p324_p8 = pneg %p292_p6 }
   0xe   : > { %p325_p9 = pnand %p324_p8, %p323_p7 }
  0x10   : > { %p326_p10 = pneg %p325_p9 }
  0x12   : > { %p333_p0 = pnand %p332_p13, %p326_p10 }
  0x14   : > { %336 = shalt.err (!%p333_p0)
}
  0x15   : > { %s365_s20 = smov [#allocation2]   ;;  %143 = sbr.rel (%p402_p3) target bundleno = 41 (0x29), region = 28 }
  0x16   : > { %294 = dma.vmem_to_smem (!%p292_p6), %s121_s18, 16, %s365_s20, [#allocation3]  }
  0x1c   : > { %350 = dma.done.wait (%p406_p4), [#allocation3], 16  }
  0x1d   : > { %352 = vsyncadd (%p406_p4), [#allocation3], 4294967280 }
  0x1e   : > { %149 = sfence }
  0x1f   : > { %p170_p1 = scmp.lt.s32.totalorder %s355_s9, 3  ;;  %s184_s21 = sld [smem:[#allocation2 + %s355_s9]] }
  0x21   : > { %s451_s9 = smov (!%p170_p1, %s355_s9), 3 }
  0x22   : > { %s283_s22 = sshll.u32 %s451_s9, 3 }
  0x23   : > { %s176_s25 = scalar_lea.vmem %s441_s0, %s283_s22  ;;  %s183_s28 = scalar_lea.vmem %s443_s2, %s283_s22 }
  0x24   : > { %v185_v0 = vld [vmem:[%s176_s25] sm:$0xff] }
  0x25   : > { %v186_v1 = vstv %s184_s21 }
  0x26   : > { %v187_v2 = vmul.f32 %v186_v1, %v185_v0 }
  0x28   : > { %188 = vst [vmem:[%s183_s28] sm:$0xff] %v187_v2 }
  0x29 PF: > { %s13_s11 = sadd.s32 1, %s363_s11   ;;  %s446_s9 = smov %s359_s10 }
  0x2a   : > { %p10_p2 = scmp.ge.s32.totalorder %s13_s11, 6   ;;  %s447_s10 = smov %s449_s13 }
  0x2c   :  { %12 = sbr.rel (!%p10_p2) target bundleno = 2 (0x2), region = 63 }
  0x33   :  { %214 = vsyncpa [#allocation3], 1 }
  0x34   :  { %216 = vsyncpa [#allocation3 + $0x1], 1 }

</bundles_post_ra>
